<compile_context>
chip_gen: v6e
topology: v6e:2x2x1
jax: 0.10.0
libtpu: 0.0.40
codegen_flags: <defaults>
</compile_context>

<pallas_src>
import functools

import numpy as np
import jax
import jax.numpy as jnp
from jax import lax
from jax.experimental import pallas as pl
from jax.experimental.pallas import tpu as pltpu


# MXU precision for the one-hot segment / gather matmuls.  HIGH (3 bf16 passes)
# is ~2x cheaper on the MXU-push slot but loses ~2^-17 relative accuracy on the
# f32 operand; HIGHEST is exact and the stats pass stays near the HBM roofline
# at the tile sizes below, so correctness wins.
_STATS_PRECISION = lax.Precision.HIGHEST
_GATHER_PRECISION = lax.Precision.HIGHEST


def _round_up(x, m):
    return (x + m - 1) // m * m


# ---------------------------------------------------------------------------
# Fused single-block kernel (small N*F): one HBM read of h + one HBM write.
# ---------------------------------------------------------------------------
def _fused_kernel(x_ref, segr_ref, segc_ref, cnt_ref, gamma_ref, beta_ref,
                  o_ref, *, eps, num_graphs_p):
    f = x_ref.shape[-1]
    x = x_ref[...].astype(jnp.float32)                    # (N, F)
    n_rows = x.shape[0]

    # Per-graph [sum(x) | sum(x*x)] in a single MXU segment-sum matmul.
    segr = segr_ref[...]                                  # (1, N) int32, lane-dense
    gid_t = lax.broadcasted_iota(jnp.int32, (num_graphs_p, n_rows), 0)
    onehot_t = (segr == gid_t).astype(jnp.float32)        # (Bp, N)
    rhs = jnp.concatenate([x, x * x], axis=1)             # (N, 2F)
    stats = lax.dot_general(onehot_t, rhs, (((1,), (0,)), ((), ())),
                            precision=_STATS_PRECISION,
                            preferred_element_type=jnp.float32)   # (Bp, 2F)

    # Finalize the per-graph affine fold: y = scale*x + shift.
    s, ss = stats[:, :f], stats[:, f:]
    n = cnt_ref[...]                                      # (Bp, 1) f32 rows per graph
    inv_n = 1.0 / jnp.maximum(n, 1.0)
    mean = s * inv_n
    # torch.std is unbiased (ddof=1); clamp guards fused-form cancellation and n==1.
    var = jnp.maximum(ss - n * mean * mean, 0.0) / jnp.maximum(n - 1.0, 1.0)
    rstd = 1.0 / (jnp.sqrt(var) + eps)
    gamma = gamma_ref[...].astype(jnp.float32)            # (1, F)
    beta = beta_ref[...].astype(jnp.float32)               # (1, F)
    scale = gamma * rstd                                   # (Bp, F)
    shift = beta - scale * mean                            # (Bp, F)

    # Gather scale/shift back to rows (one-hot MXU gather) and apply.
    segc = segc_ref[...]                                   # (N, 1) int32
    gid = lax.broadcasted_iota(jnp.int32, (n_rows, num_graphs_p), 1)
    onehot = (segc == gid).astype(jnp.float32)             # (N, Bp)
    a = jnp.dot(onehot, scale, precision=_GATHER_PRECISION,
                preferred_element_type=jnp.float32)
    c = jnp.dot(onehot, shift, precision=_GATHER_PRECISION,
                preferred_element_type=jnp.float32)
    o_ref[...] = (a * x + c).astype(o_ref.dtype)


# ---------------------------------------------------------------------------
# Two-pass tiled path (large N*F).
# ---------------------------------------------------------------------------
def _stats_partial_kernel(x_ref, seg_ref, acc_ref, *, tile_rows,
                          blocks_per_partial, n_rows, num_graphs_p):
    """Accumulate per-graph [sum(x) | sum(x*x)] partials over row tiles."""
    p = pl.program_id(0)
    i = pl.program_id(1)

    @pl.when(i == 0)
    def _init():
        acc_ref[...] = jnp.zeros_like(acc_ref)

    x = x_ref[...].astype(jnp.float32)                     # (TM, F)
    # Logical (unclamped) block id: mask rows past N so ragged-tail garbage and the
    # duplicated clamp block (odd block count with 2 partials) contribute exactly zero.
    blk = p * blocks_per_partial + i
    row = blk * tile_rows + lax.broadcasted_iota(jnp.int32, (tile_rows, 1), 0)
    x = jnp.where(row < n_rows, x, 0.0)

    seg = seg_ref[...]                                     # (1, TM) lane-dense
    gid = lax.broadcasted_iota(jnp.int32, (num_graphs_p, tile_rows), 0)
    onehot_t = (seg == gid).astype(jnp.float32)            # (Bp, TM)
    rhs = jnp.concatenate([x, x * x], axis=1)              # (TM, 2F) -> one fused matmul
    acc_ref[...] += lax.dot_general(onehot_t, rhs, (((1,), (0,)), ((), ())),
                                    precision=_STATS_PRECISION,
                                    preferred_element_type=jnp.float32)


def _norm_kernel(x_ref, seg_ref, part_ref, cnt_ref, gamma_ref, beta_ref, o_ref,
                 *, eps, num_graphs_p):
    """y = scale[graph(row)] * x + shift[graph(row)]; finalize recomputed per tile."""
    f = x_ref.shape[-1]
    # Combine partial sums and finalize the per-graph affine fold.  O(Bp*2F) work,
    # hidden under the tile's DMA; keeps the pass stateless so its grid is "parallel".
    stats = jnp.sum(part_ref[...], axis=0)                 # (Bp, 2F)
    s, ss = stats[:, :f], stats[:, f:]
    n = cnt_ref[...]                                       # (Bp, 1)
    inv_n = 1.0 / jnp.maximum(n, 1.0)
    mean = s * inv_n
    var = jnp.maximum(ss - n * mean * mean, 0.0) / jnp.maximum(n - 1.0, 1.0)
    rstd = 1.0 / (jnp.sqrt(var) + eps)
    gamma = gamma_ref[...].astype(jnp.float32)
    beta = beta_ref[...].astype(jnp.float32)
    scale = gamma * rstd                                   # (Bp, F)
    shift = beta - scale * mean                            # (Bp, F)

    x = x_ref[...].astype(jnp.float32)                     # (TM, F)
    seg = seg_ref[...]                                     # (TM, 1)
    gid = lax.broadcasted_iota(jnp.int32, (x.shape[0], num_graphs_p), 1)
    onehot = (seg == gid).astype(jnp.float32)              # (TM, Bp)
    a = jnp.dot(onehot, scale, precision=_GATHER_PRECISION,
                preferred_element_type=jnp.float32)
    c = jnp.dot(onehot, shift, precision=_GATHER_PRECISION,
                preferred_element_type=jnp.float32)
    # No tail mask needed: OOB rows of the final block are dropped on write.
    o_ref[...] = (a * x + c).astype(o_ref.dtype)


def _pick_tile_rows(F, itemsize, requested):
    if requested is not None:
        return max(128, (int(requested) // 128) * 128)
    # Per-row VMEM bytes of the heavier (normalize) pass:
    #   2 x-bufs + 2 out-bufs (native dtype) + f32 x/a/c intermediates
    #   + lane-padded (tm,1) seg buffers and (tm,Bp) one-hot intermediate.
    row_bytes = 4 * F * itemsize + 3 * F * 4 + 3 * 128 * 4 + 64
    tm = (20 * 1024 * 1024) // row_bytes
    return int(max(128, min(8192, (tm // 128) * 128)))


def graph_norm(h, graph_sizes, gamma=None, beta=None, eps=1e-5, *,
               tile_rows=None, force_two_pass=False,
               fused_vmem_budget=16 * 1024 * 1024):
    """GraphNorm forward (models/equibind.py::GraphNorm).

    h:           (N_total, F) features, rows of all graphs concatenated.
    graph_sizes: per-graph row counts (the DGL g.batch_num_nodes()/num_edges() list).
    gamma, beta: (F,) affine parameters (None -> identity affine).
    """
    N, F = h.shape
    sizes = [int(s) for s in graph_sizes]
    B = len(sizes)
    assert sum(sizes) == N, "graph_sizes must sum to h.shape[0]"
    assert N > 0

    Bp = _round_up(max(B, 1), 8)                 # graph count padded to a sublane multiple
    itemsize = jnp.dtype(h.dtype).itemsize

    if gamma is None:
        gamma = jnp.ones((F,), jnp.float32)
    if beta is None:
        beta = jnp.zeros((F,), jnp.float32)
    gamma2 = jnp.asarray(gamma).reshape(1, F)
    beta2 = jnp.asarray(beta).reshape(1, F)

    # Host-side static metadata.  Same (N, B, F, dtype, tm) -> same executables; only
    # the *values* of seg/cnt change with graph_sizes.
    # TODO(synk): bucket (N, B) to a few padded sizes if batch shapes vary per call.
    ids = np.repeat(np.arange(B, dtype=np.int32), np.asarray(sizes, dtype=np.int64))
    seg_row = jnp.asarray(ids.reshape(1, N))     # lane-dense layout for the stats pass
    seg_col = jnp.asarray(ids.reshape(N, 1))     # sublane layout for the gather pass
    cnt_np = np.zeros((Bp, 1), dtype=np.float32)
    cnt_np[:B, 0] = np.asarray(sizes, dtype=np.float32)
    cnt = jnp.asarray(cnt_np)

    # ---- small-batch fast path: everything resident in VMEM, 1 read + 1 write of h ----
    fused_est = N * (8 * F * 4 + 4 * _round_up(Bp, 128) + 64) + Bp * 8 * F
    if not force_two_pass and fused_est <= fused_vmem_budget:
        return pl.pallas_call(
            functools.partial(_fused_kernel, eps=float(eps), num_graphs_p=Bp),
            out_shape=jax.ShapeDtypeStruct((N, F), h.dtype),
            compiler_params=pltpu.CompilerParams(
                vmem_limit_bytes=int(min(2 * fused_vmem_budget + (8 << 20), 48 << 20))),
        )(h, seg_row, seg_col, cnt, gamma2, beta2)

    # ---- two-pass tiled path ----
    tm = _pick_tile_rows(F, itemsize, tile_rows)
    nblocks = int(pl.cdiv(N, tm))
    # Split the stats sweep into 2 independent partial sums so the outer axis can be
    # "parallel" (sharded across v7x's 2 TensorCores; a harmless serial loop elsewhere).
    P = 2 if nblocks >= 2 else 1
    nb_inner = int(pl.cdiv(nblocks, P))

    est = max(
        # stats pass: 2 x-bufs, 2 (1,tm) seg bufs, f32 x, [x|x^2] rhs, (Bp,tm) one-hot
        2 * tm * F * itemsize + 2 * 8 * tm * 4 + tm * F * 4 + tm * 2 * F * 4
        + _round_up(Bp, 8) * tm * 4,
        # normalize pass: 2 x-bufs + 2 out-bufs, 2 lane-padded seg bufs, one-hot, f32 tmp
        4 * tm * F * itemsize + 3 * tm * 128 * 4 + 3 * tm * F * 4,
    ) + 4 * Bp * 2 * F
    vmem_limit = int(min(max(2 * est, 16 << 20), 48 << 20))

    def x_map(p, i):
        return (jnp.minimum(p * nb_inner + i, nblocks - 1), 0)

    def seg_map(p, i):
        return (0, jnp.minimum(p * nb_inner + i, nblocks - 1))

    partials = pl.pallas_call(
        functools.partial(_stats_partial_kernel, tile_rows=tm,
                          blocks_per_partial=nb_inner, n_rows=N, num_graphs_p=Bp),
        out_shape=jax.ShapeDtypeStruct((P, Bp, 2 * F), jnp.float32),
        grid=(P, nb_inner),
        in_specs=[
            pl.BlockSpec((tm, F), x_map),
            pl.BlockSpec((1, tm), seg_map),
        ],
        out_specs=pl.BlockSpec((None, Bp, 2 * F), lambda p, i: (p, 0, 0)),
        compiler_params=pltpu.CompilerParams(
            dimension_semantics=("parallel", "arbitrary"),
            vmem_limit_bytes=vmem_limit),
    )(h, seg_row)

    out = pl.pallas_call(
        functools.partial(_norm_kernel, eps=float(eps), num_graphs_p=Bp),
        out_shape=jax.ShapeDtypeStruct((N, F), h.dtype),
        grid=(nblocks,),
        in_specs=[
            pl.BlockSpec((tm, F), lambda i: (i, 0)),
            pl.BlockSpec((tm, 1), lambda i: (i, 0)),
            pl.BlockSpec((P, Bp, 2 * F), lambda i: (0, 0, 0)),
            pl.BlockSpec((Bp, 1), lambda i: (0, 0)),
            pl.BlockSpec((1, F), lambda i: (0, 0)),
            pl.BlockSpec((1, F), lambda i: (0, 0)),
        ],
        out_specs=pl.BlockSpec((tm, F), lambda i: (i, 0)),
        compiler_params=pltpu.CompilerParams(
            dimension_semantics=("parallel",),
            vmem_limit_bytes=vmem_limit),
    )(h, seg_col, partials, cnt, gamma2, beta2)

    return out


def _graph_norm_ref(h, graph_sizes, gamma, beta, eps=1e-5):
    """Pure-JAX reference mirroring the PyTorch module (std with ddof=1)."""
    offsets = np.concatenate([[0], np.cumsum(graph_sizes)]).astype(np.int64)
    outs = []
    for b in range(len(graph_sizes)):
        xb = h[offsets[b]:offsets[b + 1]]
        mean = xb.mean(axis=0, keepdims=True)
        std = xb.std(axis=0, keepdims=True, ddof=1)
        outs.append((xb - mean) / (std + eps))
    return gamma * jnp.concatenate(outs, axis=0) + beta


if __name__ == "__main__":
    num_features = 32
    gamma = jnp.ones((num_features,), dtype=jnp.float32)
    beta = jnp.zeros((num_features,), dtype=jnp.float32)

    # Case 1: tiny batch -> fused single-block path (1 read + 1 write of h).
    sizes1 = [5, 8, 3]
    h1 = jax.random.normal(jax.random.PRNGKey(0), (sum(sizes1), num_features),
                           dtype=jnp.float32)
    out1 = jax.block_until_ready(graph_norm(h1, sizes1, gamma, beta, eps=1e-5))
    ref1 = _graph_norm_ref(h1, sizes1, gamma, beta, eps=1e-5)
    np.testing.assert_allclose(np.asarray(out1), np.asarray(ref1),
                               rtol=1e-5, atol=1e-5)

    # Case 2: two-pass tiled path -- multiple row tiles, graphs spanning tile
    # boundaries, a ragged last tile, and the 2-way partial-sum split.
    sizes2 = [37, 5, 64, 18, 12, 200, 71]          # N = 407 -> 4 tiles of 128 rows
    h2 = jax.random.normal(jax.random.PRNGKey(0), (sum(sizes2), num_features),
                           dtype=jnp.float32)
    out2 = jax.block_until_ready(
        graph_norm(h2, sizes2, gamma, beta, eps=1e-5,
                   tile_rows=128, force_two_pass=True))
    ref2 = _graph_norm_ref(h2, sizes2, gamma, beta, eps=1e-5)
    np.testing.assert_allclose(np.asarray(out2), np.asarray(ref2),
                               rtol=1e-5, atol=1e-5)

    print("KERNEL_OK")
</pallas_src>

<mosaic_0001>
module attributes {stable_mosaic.version = 11 : i64} {
  func.func @_fused_kernel(%arg0: memref<16x32xf32, #tpu.memory_space<vmem>>, %arg1: memref<1x16xi32, #tpu.memory_space<vmem>>, %arg2: memref<16x1xi32, #tpu.memory_space<vmem>>, %arg3: memref<8x1xf32, #tpu.memory_space<vmem>>, %arg4: memref<1x32xf32, #tpu.memory_space<vmem>>, %arg5: memref<1x32xf32, #tpu.memory_space<vmem>>, %arg6: memref<16x32xf32, #tpu.memory_space<vmem>>) attributes {dimension_semantics = [], scalar_prefetch = 0 : i64, scratch_operands = 0 : i64, tpu.core_type = #tpu.core_type<tc>} {
    %c0 = arith.constant 0 : index
    %c0_0 = arith.constant 0 : index
    %0 = vector.load %arg0[%c0, %c0_0] : memref<16x32xf32, #tpu.memory_space<vmem>>, vector<16x32xf32>
    %c0_1 = arith.constant 0 : index
    %c0_2 = arith.constant 0 : index
    %1 = vector.load %arg1[%c0_1, %c0_2] : memref<1x16xi32, #tpu.memory_space<vmem>>, vector<1x16xi32>
    %2 = tpu.iota {dimensions = array<i32: 0>} : vector<8x16xi32>
    %3 = vector.broadcast %1 : vector<1x16xi32> to vector<8x16xi32>
    %4 = arith.cmpi eq, %3, %2 : vector<8x16xi32>
    %5 = arith.extui %4 : vector<8x16xi1> to vector<8x16xi32>
    %6 = arith.sitofp %5 : vector<8x16xi32> to vector<8x16xf32>
    %7 = arith.mulf %0, %0 : vector<16x32xf32>
    %8 = tpu.concatenate %0, %7 in 1 : vector<16x32xf32>, vector<16x32xf32> -> vector<16x64xf32>
    %cst = arith.constant dense<0.000000e+00> : vector<8x64xf32>
    %9 = tpu.matmul %6, %8, %cst {dimension_numbers = #tpu.dot_dimension_numbers<[1], [0], [0], [1], [0, 0, 1, 1], [], []>, precision = #tpu.contract_precision<fp32>} : vector<8x16xf32>, vector<16x64xf32>, vector<8x64xf32> -> vector<8x64xf32>
    %10 = vector.extract_strided_slice %9 {offsets = [0, 0], sizes = [8, 32], strides = [1, 1]} : vector<8x64xf32> to vector<8x32xf32>
    %11 = vector.extract_strided_slice %9 {offsets = [0, 32], sizes = [8, 32], strides = [1, 1]} : vector<8x64xf32> to vector<8x32xf32>
    %c0_3 = arith.constant 0 : index
    %c0_4 = arith.constant 0 : index
    %12 = vector.load %arg3[%c0_3, %c0_4] : memref<8x1xf32, #tpu.memory_space<vmem>>, vector<8x1xf32>
    %cst_5 = arith.constant 1.000000e+00 : f32
    %13 = vector.broadcast %cst_5 : f32 to vector<8x1xf32>
    %14 = arith.maximumf %12, %13 : vector<8x1xf32>
    %cst_6 = arith.constant 1.000000e+00 : f32
    %15 = vector.broadcast %cst_6 : f32 to vector<8x1xf32>
    %16 = arith.divf %15, %14 : vector<8x1xf32>
    %17 = vector.broadcast %16 : vector<8x1xf32> to vector<8x32xf32>
    %18 = arith.mulf %10, %17 : vector<8x32xf32>
    %19 = vector.broadcast %12 : vector<8x1xf32> to vector<8x32xf32>
    %20 = arith.mulf %19, %18 : vector<8x32xf32>
    %21 = arith.mulf %20, %18 : vector<8x32xf32>
    %22 = arith.subf %11, %21 : vector<8x32xf32>
    %cst_7 = arith.constant 0.000000e+00 : f32
    %23 = vector.broadcast %cst_7 : f32 to vector<8x32xf32>
    %24 = arith.maximumf %22, %23 : vector<8x32xf32>
    %cst_8 = arith.constant 1.000000e+00 : f32
    %25 = vector.broadcast %cst_8 : f32 to vector<8x1xf32>
    %26 = arith.subf %12, %25 : vector<8x1xf32>
    %cst_9 = arith.constant 1.000000e+00 : f32
    %27 = vector.broadcast %cst_9 : f32 to vector<8x1xf32>
    %28 = arith.maximumf %26, %27 : vector<8x1xf32>
    %29 = vector.broadcast %28 : vector<8x1xf32> to vector<8x32xf32>
    %30 = arith.divf %24, %29 : vector<8x32xf32>
    %31 = math.sqrt %30 : vector<8x32xf32>
    %cst_10 = arith.constant 9.99999974E-6 : f32
    %32 = vector.broadcast %cst_10 : f32 to vector<8x32xf32>
    %33 = arith.addf %31, %32 : vector<8x32xf32>
    %cst_11 = arith.constant 1.000000e+00 : f32
    %34 = vector.broadcast %cst_11 : f32 to vector<8x32xf32>
    %35 = arith.divf %34, %33 : vector<8x32xf32>
    %c0_12 = arith.constant 0 : index
    %c0_13 = arith.constant 0 : index
    %36 = vector.load %arg4[%c0_12, %c0_13] : memref<1x32xf32, #tpu.memory_space<vmem>>, vector<1x32xf32>
    %c0_14 = arith.constant 0 : index
    %c0_15 = arith.constant 0 : index
    %37 = vector.load %arg5[%c0_14, %c0_15] : memref<1x32xf32, #tpu.memory_space<vmem>>, vector<1x32xf32>
    %38 = vector.broadcast %36 : vector<1x32xf32> to vector<8x32xf32>
    %39 = arith.mulf %38, %35 : vector<8x32xf32>
    %40 = arith.mulf %39, %18 : vector<8x32xf32>
    %41 = vector.broadcast %37 : vector<1x32xf32> to vector<8x32xf32>
    %42 = arith.subf %41, %40 : vector<8x32xf32>
    %c0_16 = arith.constant 0 : index
    %c0_17 = arith.constant 0 : index
    %43 = vector.load %arg2[%c0_16, %c0_17] : memref<16x1xi32, #tpu.memory_space<vmem>>, vector<16x1xi32>
    %44 = tpu.iota {dimensions = array<i32: 1>} : vector<16x8xi32>
    %45 = vector.broadcast %43 : vector<16x1xi32> to vector<16x8xi32>
    %46 = arith.cmpi eq, %45, %44 : vector<16x8xi32>
    %47 = arith.extui %46 : vector<16x8xi1> to vector<16x8xi32>
    %48 = arith.sitofp %47 : vector<16x8xi32> to vector<16x8xf32>
    %cst_18 = arith.constant dense<0.000000e+00> : vector<16x32xf32>
    %49 = tpu.matmul %48, %39, %cst_18 {dimension_numbers = #tpu.dot_dimension_numbers<[1], [0], [0], [1], [0, 0, 1, 1], [], []>, precision = #tpu.contract_precision<fp32>} : vector<16x8xf32>, vector<8x32xf32>, vector<16x32xf32> -> vector<16x32xf32>
    %cst_19 = arith.constant dense<0.000000e+00> : vector<16x32xf32>
    %50 = tpu.matmul %48, %42, %cst_19 {dimension_numbers = #tpu.dot_dimension_numbers<[1], [0], [0], [1], [0, 0, 1, 1], [], []>, precision = #tpu.contract_precision<fp32>} : vector<16x8xf32>, vector<8x32xf32>, vector<16x32xf32> -> vector<16x32xf32>
    %51 = arith.mulf %49, %0 : vector<16x32xf32>
    %52 = arith.addf %51, %50 : vector<16x32xf32>
    %c0_20 = arith.constant 0 : index
    %c0_21 = arith.constant 0 : index
    %53 = vector.load %arg6[%c0_20, %c0_21] : memref<16x32xf32, #tpu.memory_space<vmem>>, vector<16x32xf32>
    tpu.vector_store %arg6[%c0_20, %c0_21], %52 {strides = array<i32>} : memref<16x32xf32, #tpu.memory_space<vmem>>, vector<16x32xf32>,
    return
  }
}

</mosaic_0001>

<bundles_post_ra>
// kernel: tpu_custom_call.1
= control target key start
LH: loop header
LB: loop body
LE: loop exit
PB: predicated region body
PF: predicated region fallthrough
CT: control target
= control target key end

     0   :  { %v1816_v3 = vmov 0.0   ;;  %vm1817_vm0 = vmmov 0   ;;  %s1981_s0 = inlined_call_operand.vmem [shape: f32[16,32], index: 0, kind: input, shape index: {}]   ;;  %s1982_s1 = inlined_call_operand.vmem [shape: s32[1,16], index: 1, kind: input, shape index: {}]   ;;  %s1983_s2 = inlined_call_operand.vmem [shape: s32[16,1], index: 2, kind: input, shape index: {}]   ;;  %s1984_s3 = inlined_call_operand.vmem [shape: f32[8,1], index: 3, kind: input, shape index: {}]   ;;  %s1985_s4 = inlined_call_operand.vmem [shape: f32[1,32], index: 4, kind: input, shape index: {}]   ;;  %s1986_s5 = inlined_call_operand.vmem [shape: f32[1,32], index: 5, kind: input, shape index: {}]   ;;  %s1987_s6 = inlined_call_operand.hbm [shape: f32[16,32], index: 6, kind: output, shape index: {}]  }
   0x1   :  { %v1862_v0 = vld [vmem:[%s1981_s0 + $0x8] sm:$0xff]  ;;  %v1867_v1 = vld [vmem:[%s1981_s0] sm:$0xff]  ;;  %1674 = vmatprep.subr.mxu0 %v1816_v3  ;;  %1678 = vmatprep.mubr.msk.f32.mxu0 %vm1817_vm0, %v1816_v3 }
   0x2   :  { %v37_v2 = vmul.f32 %v1862_v0, %v1862_v0 }
   0x3   :  { %11 = vsyncpa [#allocation3], 0  ;;  %1681 = vmatprep.subr.mxu1 %v1816_v3  ;;  %1685 = vmatprep.mubr.msk.f32.mxu1 %vm1817_vm0, %v1816_v3  ;;  %s1818_s25 = smov 32   ;;  %v36_v4 = vmul.f32 %v1867_v1, %v1867_v1  ;;  %v512_v5 = vld [vmem:[%s1984_s3] sm:$0xff]  ;;  %v1819_v6 = vmov 0   ;;  %v576_v10 = vld [vmem:[%s1983_s2 + $0x8] sm:$0xff]  ;;  %v27_v12 = vlaneseq }
   0x4   :  { %42 = vrot.lane.b32.xlu0 %v37_v2, %s1818_s25  ;;  %1784 = vset.pattern.permute.xlu1 %v1819_v6  ;;  %v513_v7 = vmax.f32 %v512_v5, 1.0  ;;  %v1603_v8 = vadd.f32 -1.0, %v512_v5  ;;  %v1598_v14 = vld [vmem:[%s1982_s1] ss:$0 sm:$0xff]  ;;  %vm49_vm2 = vcmask 130048   ;;  %vm46_vm3 = vcmask 261120  }
   0x5   :  { %1785 = vset.pattern.permute.xlu0 %v1819_v6  ;;  %v28_v13 = vshrl.u32 %v27_v12, 7  ;;  %v575_v57 = vld [vmem:[%s1983_s2] sm:$0xff]  ;;  %v578_v2 = vand.u32 127, %v27_v12  ;;  %vm591_vm5 = vcmask 64512   ;;  %s1820_s2 = smov 96  }
   0x6   :  { %1786 = vrcp.f32 %v513_v7  ;;  %v536_v9 = vmax.f32 %v1603_v8, 1.0 }
   0x7   :  { %vm33_vm1 = vcmp.eq.s32.totalorder %v1598_v14, %v28_v13 }
   0x8   :  { %40 = vrot.lane.b32.xlu0 %v36_v4, %s1818_s25  ;;  %v1599_v15 = vsel %vm33_vm1, 1.0, %v1816_v3 }
   0x9   :  { %v51_v16 = vsel %vm49_vm2, %v1599_v15, 0 }
   0xa   :  { %v121_v17 = vsub.f32 %v51_v16, %v51_v16 }
   0xc   :  { %539 = vperm.xlu0 %1785, %v536_v9   ;;  %v122_v18 = vand.u32 4294901760, %v121_v17 }
   0xe   :  { %v123_v21 = vsub.f32 %v121_v17, %v122_v18 }
  0x10   :  { %583 = vperm.xlu0 %1785, %v576_v10   ;;  %v124_v26 = vand.u32 4294901760, %v123_v21 }
  0x13   :  { %v1787_v11 = vpop.eup %1786 }
  0x14   :  { %518 = vperm.xlu1 %1784, %v1787_v11  }
  0x18   :  { %524 = vperm.xlu1 %1784, %v512_v5  }
  0x76   :  { %v43_v19 = vpop.permute.xlu0 %42 }
  0x77   :  { %v48_v20 = vsel %vm46_vm3, %v1862_v0, %v43_v19 }
  0x78   :  { %v82_v22 = vand.u32 4294901760, %v48_v20 }
  0x7a   :  { %v160_v23 = vsub.f32 %v48_v20, %v82_v22  ;;  %1675 = vmatpush3.msra.mxu0 %v82_v22  ;;  %v41_v24 = vpop.permute.xlu0 %40 }
  0x7b   :  { %v47_v25 = vsel %vm46_vm3, %v1867_v1, %v41_v24  ;;  %1676 = vmatprep.subr.mxu0 %v1816_v3 }
  0x7c   :  { %v85_v27 = vand.u32 4294901760, %v47_v25  ;;  %v161_v28 = vand.u32 4294901760, %v160_v23 }
  0x7e   :  { %v167_v29 = vsub.f32 %v47_v25, %v85_v27  ;;  %1677 = vmatpush3.msra.mxu0 %v85_v27  ;;  %v162_v30 = vsub.f32 %v160_v23, %v161_v28 }
  0x7f   :  { %1688 = vmatprep.subr.mxu0 %v1816_v3  ;;  %1679 = vmatmul.mubr.f32.vlgmr.msra.gmra.mxu0 %v124_v26 }
  0x80   :  { %1689 = vmatpush3.msra.mxu0 %v160_v23  ;;  %v163_v31 = vand.u32 4294901760, %v162_v30  ;;  %1692 = vmatprep.mubr.msk.f32.mxu0 %vm1817_vm0, %v1816_v3  ;;  %v168_v32 = vand.u32 4294901760, %v167_v29  ;;  %v1604_v23 = vld [vmem:[%s1985_s4] ss:$0 sm:$0xff]  ;;  %s1821_s4 = smov [#allocation2]  }
  0x81   :  { %1690 = vmatprep.subr.mxu0 %v1816_v3 }
  0x82   :  { %1682 = vmatpush3.msra.mxu1 %v163_v31  ;;  %1691 = vmatpush3.msra.mxu0 %v167_v29  ;;  %v169_v33 = vsub.f32 %v167_v29, %v168_v32 }
  0x83   :  { %1702 = vmatprep.subr.mxu0 %v1816_v3  ;;  %1693 = vmatmul.mubr.f32.vlgmr.msra.gmra.mxu0 %v121_v17 }
  0x84   :  { %1703 = vmatpush3.msra.mxu0 %v161_v28  ;;  %1683 = vmatprep.subr.mxu1 %v1816_v3  ;;  %v170_v34 = vand.u32 4294901760, %v169_v33 }
  0x85   :  { %1704 = vmatprep.subr.mxu0 %v1816_v3  ;;  %1706 = vmatprep.mubr.msk.f32.mxu0 %vm1817_vm0, %v1816_v3 }
  0x86   :  { %1684 = vmatpush3.msra.mxu1 %v170_v34  ;;  %1705 = vmatpush3.msra.mxu0 %v168_v32 }
  0x87   :  { %1686 = vmatmul.mubr.msk.f32.vlgmr.msra.gmra.mxu1 %vm49_vm2, %v1599_v15  ;;  %1695 = vmatprep.subr.mxu1 %v1816_v3  ;;  %v540_v58 = vpop.permute.xlu0 %539 }
  0x88   :  { %1696 = vmatpush3.msra.mxu1 %v82_v22  ;;  %1699 = vmatprep.mubr.msk.f32.mxu1 %vm1817_vm0, %v1816_v3  ;;  %1788 = vrcp.f32 %v540_v58 }
  0x89   :  { %1697 = vmatprep.subr.mxu1 %v1816_v3  ;;  %1707 = vmatmul.mubr.msk.f32.vlgmr.msra.gmra.mxu0 %vm49_vm2, %v1599_v15 }
  0x8a   :  { %1698 = vmatpush3.msra.mxu1 %v85_v27 }
  0x8b   :  { %1700 = vmatmul.mubr.f32.vlgmr.msra.gmra.mxu1 %v122_v18  ;;  %1709 = vmatprep.subr.mxu1 %v1816_v3  ;;  %v584_v18 = vpop.permute.xlu0 %583 }
  0x8c   :  { %1710 = vmatpush3.msra.mxu1 %v82_v22  ;;  %1713 = vmatprep.mubr.msk.f32.mxu1 %vm1817_vm0, %v1816_v3  ;;  %vm586_vm8 = vcmp.eq.s32.totalorder %v584_v18, %v578_v2 }
  0x8d   :  { %1711 = vmatprep.subr.mxu1 %v1816_v3  ;;  %v1938_v19 = vsel %vm586_vm8, 1.0, %v1816_v3 }
  0x8e   :  { %1712 = vmatpush3.msra.mxu1 %v85_v27  ;;  %v596_v20 = vsel %vm591_vm5, %v1938_v19, 0  ;;  %v1605_v27 = vld [vmem:[%s1986_s5] ss:$0 sm:$0xff]  ;;  %s1587_s5 = sshll.u32 %s1821_s4, 4  ;;  %s1588_s5 = int_to_ptr.vmem [resolvable:$true] %s1587_s5 }
  0x8f   :  { %1714 = vmatmul.mubr.msk.f32.vlgmr.msra.gmra.mxu1 %vm49_vm2, %v1599_v15  ;;  %v519_v47 = vpop.permute.xlu1 %518  ;;  %v675_v21 = vsub.f32 %v596_v20, %v596_v20  ;;  %s1794_s11 = scalar_lea.vmem %s1588_s5, 256  ;;  %p1799_p1 = scmp.lt.s32.totalorder %s1588_s5, %s1588_s5 }
  0x90   :  { %p1795_p0 = scmp.ne.s32.totalorder %s1588_s5, %s1794_s11  ;;  %p1800_p2 = scmp.lt.s32.totalorder %s1794_s11, %s1794_s11 }
  0x91   :  { %v676_v22 = vand.u32 4294901760, %v675_v21 }
  0x92   :  { %p1801_p3 = por %p1800_p2, %p1799_p1 }
  0x93   :  { %v525_v54 = vpop.permute.xlu1 %524  ;;  %v677_v26 = vsub.f32 %v675_v21, %v676_v22 }
  0x94   :  { %p1802_p4 = pnand %p1801_p3, %p1795_p0 }
  0x95   :  { %v1789_v61 = vpop.eup %1788  ;;  %v678_v31 = vand.u32 4294901760, %v677_v26 }
 0x13f   :  { %v126_v35 = vpop.f32.mrf.mxu0 }
 0x141   :  { %v1680_v36 = vpop.f32.mrf.mxu0 }
 0x143   :  { %v283_v37 = vpop.f32.mrf.mxu0 }
 0x145   :  { %v1694_v38 = vpop.f32.mrf.mxu0 }
 0x147   :  { %v207_v39 = vpop.f32.mrf.mxu1 }
 0x148   :  { %v208_v40 = vadd.f32 %v207_v39, %v126_v35 }
 0x149   :  { %v1687_v41 = vpop.f32.mrf.mxu1  ;;  %v435_v42 = vpop.f32.mrf.mxu0 }
 0x14a   :  { %v284_v43 = vadd.f32 %v283_v37, %v208_v40 }
 0x14b   :  { %v358_v44 = vpop.f32.mrf.mxu1  ;;  %v1708_v45 = vpop.f32.mrf.mxu0 }
 0x14c   :  { %v359_v46 = vadd.f32 %v358_v44, %v284_v43 }
 0x14d   :  { %v1701_v48 = vpop.f32.mrf.mxu1 }
 0x14e   :  { %v436_v49 = vadd.f32 %v435_v42, %v359_v46 }
 0x14f   :  { %v508_v50 = vpop.f32.mrf.mxu1 }
 0x150   :  { %v509_v51 = vadd.f32 %v508_v50, %v436_v49 }
 0x151   :  { %v1715_v52 = vpop.f32.mrf.mxu1 }
 0x152   :  { %v521_v53 = vmul.f32 %v519_v47, %v509_v51 }
 0x154   :  { %v527_v55 = vmul.f32 %v525_v54, %v521_v53 }
 0x156   :  { %v528_v56 = vmul.f32 %v527_v55, %v521_v53 }
 0x158   :  { %530 = vrot.lane.b32.xlu1 %v528_v56, %s1818_s25 }
 0x15c   :  { %580 = vperm.xlu1 %1784, %v575_v57  }
 0x1ca   :  { %v531_v59 = vpop.permute.xlu1 %530 }
 0x1cb   :  { %v533_v60 = vsub.f32 %v509_v51, %v531_v59 }
 0x1cd   :  { %v534_v62 = vmax.f32 %v533_v60, 0.0 }
 0x1cf   :  { %v543_v63 = vmul.f32 %v1789_v61, %v534_v62 }
 0x1d1   :  { %1790 = vrsqrt.f32 %v543_v63  ;;  %vm546_vm6 = vcmp.eq.f32.partialorder %v543_v63, inf  ;;  %v549_v12 = vand.u32 2147483648, %v543_v63  ;;  %vm548_vm7 = vcmp.eq.f32.partialorder %v543_v63, 0.0 }
 0x1d7   :  { %v581_v4 = vpop.permute.xlu1 %580 }
 0x1d8   :  { %vm585_vm4 = vcmp.eq.s32.totalorder %v581_v4, %v578_v2 }
 0x1d9   :  { %v1924_v5 = vsel %vm585_vm4, 1.0, %v1816_v3 }
 0x1da   :  { %1723 = vmatprep.mubr.msk.f32.mxu1 %vm591_vm5, %v1924_v5  ;;  %v593_v6 = vsel %vm591_vm5, %v1924_v5, 0 }
 0x1db   :  { %v1930_v7 = vsub.f32 %v593_v6, %v593_v6 }
 0x1dd   :  { %v1933_v8 = vand.u32 4294901760, %v1930_v7 }
 0x1de   :  { %v1791_v9 = vpop.eup %1790 }
 0x1df   :  { %v545_v10 = vmul.f32 %v1791_v9, %v543_v63  ;;  %v667_v11 = vsub.f32 %v1930_v7, %v1933_v8 }
 0x1e1   :  { %v547_v13 = vsel %vm546_vm6, %v543_v63, %v545_v10  ;;  %v668_v14 = vand.u32 4294901760, %v667_v11 }
 0x1e2   :  { %v550_v15 = vsel %vm548_vm7, %v549_v12, %v547_v13 }
 0x1e3   :  { %v551_v16 = vadd.f32 1e-05, %v550_v15  ;;  %1718 = vmatprep.mubr.f32.mxu0 %v668_v14 }
 0x1e5   :  { %1792 = vrcp.f32 %v551_v16 }
 0x1f2   :  { %v1793_v17 = vpop.eup %1792 }
 0x1f3   :  { %563 = vrot.lane.b32.xlu1 %v1793_v17, %s1820_s2 }
 0x265   :  { %v564_v24 = vpop.permute.xlu1 %563 }
 0x266   :  { %v566_v25 = vmul.f32 %v1604_v23, %v564_v24 }
 0x268   :  { %v567_v28 = vmul.f32 %v566_v25, %v521_v53  ;;  %v629_v29 = vand.u32 4294901760, %v566_v25 }
 0x26a   :  { %v574_v3 = vsub.f32 %v1605_v27, %v567_v28  ;;  %v716_v30 = vsub.f32 %v566_v25, %v629_v29  ;;  %1716 = vmatprep.subr.mxu0 %v629_v29 }
 0x26b   :  { %1717 = vmatpush3.msra.mxu0 %v629_v29 }
 0x26c   :  { %v1118_v32 = vand.u32 4294901760, %v574_v3  ;;  %1719 = vmatmul.mubr.f32.vlgmr.msra.gmra.mxu0 %v678_v31  ;;  %1726 = vmatprep.subr.mxu0 %v716_v30  ;;  %v717_v33 = vand.u32 4294901760, %v716_v30 }
 0x26d   :  { %1727 = vmatpush3.msra.mxu0 %v716_v30  ;;  %1728 = vmatprep.mubr.f32.mxu0 %v1930_v7 }
 0x26e   :  { %1736 = vmatprep.subr.mxu0 %v717_v33  ;;  %v718_v34 = vsub.f32 %v716_v30, %v717_v33  ;;  %v1205_v35 = vsub.f32 %v574_v3, %v1118_v32 }
 0x270   :  { %1729 = vmatmul.mubr.f32.vlgmr.msra.gmra.mxu0 %v675_v21  ;;  %v719_v36 = vand.u32 4294901760, %v718_v34  ;;  %v1206_v37 = vand.u32 4294901760, %v1205_v35 }
 0x271   :  { %1737 = vmatpush3.msra.mxu0 %v717_v33  ;;  %1738 = vmatprep.mubr.msk.f32.mxu0 %vm591_vm5, %v1924_v5 }
 0x272   :  { %1746 = vmatprep.subr.mxu0 %v1118_v32  ;;  %1721 = vmatprep.subr.mxu1 %v719_v36  ;;  %v1207_v38 = vsub.f32 %v1205_v35, %v1206_v37 }
 0x273   :  { %1722 = vmatpush3.msra.mxu1 %v719_v36 }
 0x274   :  { %1724 = vmatmul.mubr.msk.f32.vlgmr.msra.gmra.mxu1 %vm591_vm5, %v1938_v19  ;;  %1731 = vmatprep.subr.mxu1 %v629_v29  ;;  %v1208_v39 = vand.u32 4294901760, %v1207_v38 }
 0x275   :  { %1739 = vmatmul.mubr.msk.f32.vlgmr.msra.gmra.mxu0 %vm591_vm5, %v1938_v19  ;;  %1732 = vmatpush3.msra.mxu1 %v629_v29 }
 0x276   :  { %1747 = vmatpush3.msra.mxu0 %v1118_v32  ;;  %1733 = vmatprep.mubr.f32.mxu1 %v1933_v8 }
 0x277   :  { %1748 = vmatprep.mubr.f32.mxu0 %v668_v14  ;;  %1756 = vmatprep.subr.mxu0 %v1205_v35 }
 0x278   :  { %1741 = vmatprep.subr.mxu1 %v629_v29  ;;  %1734 = vmatmul.mubr.f32.vlgmr.msra.gmra.mxu1 %v676_v22 }
 0x279   :  { %1742 = vmatpush3.msra.mxu1 %v629_v29  ;;  %1749 = vmatmul.mubr.f32.vlgmr.msra.gmra.mxu0 %v678_v31 }
 0x27a   :  { %1757 = vmatpush3.msra.mxu0 %v1205_v35  ;;  %1743 = vmatprep.mubr.msk.f32.mxu1 %vm591_vm5, %v1924_v5 }
 0x27b   :  { %1751 = vmatprep.subr.mxu1 %v1208_v39  ;;  %1758 = vmatprep.mubr.f32.mxu0 %v1930_v7 }
 0x27c   :  { %1766 = vmatprep.subr.mxu0 %v1206_v37  ;;  %1744 = vmatmul.mubr.msk.f32.vlgmr.msra.gmra.mxu1 %vm591_vm5, %v1938_v19 }
 0x27d   :  { %1752 = vmatpush3.msra.mxu1 %v1208_v39  ;;  %1759 = vmatmul.mubr.f32.vlgmr.msra.gmra.mxu0 %v675_v21 }
 0x27e   :  { %1767 = vmatpush3.msra.mxu0 %v1206_v37  ;;  %1753 = vmatprep.mubr.msk.f32.mxu1 %vm591_vm5, %v1924_v5 }
 0x27f   :  { %1761 = vmatprep.subr.mxu1 %v1118_v32  ;;  %1768 = vmatprep.mubr.msk.f32.mxu0 %vm591_vm5, %v1924_v5 }
 0x280   :  { %1754 = vmatmul.mubr.msk.f32.vlgmr.msra.gmra.mxu1 %vm591_vm5, %v1938_v19 }
 0x281   :  { %1762 = vmatpush3.msra.mxu1 %v1118_v32  ;;  %1769 = vmatmul.mubr.msk.f32.vlgmr.msra.gmra.mxu0 %vm591_vm5, %v1938_v19 }
 0x282   :  { %1763 = vmatprep.mubr.f32.mxu1 %v1933_v8  ;;  %1771 = vmatprep.subr.mxu1 %v1118_v32 }
 0x284   :  { %1764 = vmatmul.mubr.f32.vlgmr.msra.gmra.mxu1 %v676_v22 }
 0x285   :  { %1772 = vmatpush3.msra.mxu1 %v1118_v32  ;;  %1773 = vmatprep.mubr.msk.f32.mxu1 %vm591_vm5, %v1924_v5 }
 0x288   :  { %1774 = vmatmul.mubr.msk.f32.vlgmr.msra.gmra.mxu1 %vm591_vm5, %v1938_v19 }
 0x32c   :  { %v1720_v40 = vpop.f32.mrf.mxu0 }
 0x32e   :  { %v670_v41 = vpop.f32.mrf.mxu0 }
 0x330   :  { %v1730_v42 = vpop.f32.mrf.mxu0 }
 0x332   :  { %v836_v43 = vpop.f32.mrf.mxu0 }
 0x334   :  { %v1725_v44 = vpop.f32.mrf.mxu1 }
 0x335   :  { %v763_v45 = vadd.f32 %v1725_v44, %v1720_v40  ;;  %v1740_v46 = vpop.f32.mrf.mxu0 }
 0x336   :  { %v756_v47 = vpop.f32.mrf.mxu1 }
 0x337   :  { %v757_v48 = vadd.f32 %v756_v47, %v670_v41  ;;  %v999_v49 = vpop.f32.mrf.mxu0  ;;  %v844_v51 = vadd.f32 %v1730_v42, %v763_v45 }
 0x338   :  { %v1735_v50 = vpop.f32.mrf.mxu1 }
 0x339   :  { %v1750_v52 = vpop.f32.mrf.mxu0  ;;  %v837_v54 = vadd.f32 %v836_v43, %v757_v48  ;;  %v926_v57 = vadd.f32 %v1735_v50, %v844_v51 }
 0x33a   :  { %v917_v53 = vpop.f32.mrf.mxu1 }
 0x33b   :  { %v1159_v55 = vpop.f32.mrf.mxu0  ;;  %v918_v60 = vadd.f32 %v917_v53, %v837_v54  ;;  %v1006_v63 = vadd.f32 %v1740_v46, %v926_v57 }
 0x33c   :  { %v1745_v56 = vpop.f32.mrf.mxu1 }
 0x33d   :  { %v1760_v58 = vpop.f32.mrf.mxu0  ;;  %v1000_v5 = vadd.f32 %v999_v49, %v918_v60  ;;  %v1084_v10 = vadd.f32 %v1745_v56, %v1006_v63 }
 0x33e   :  { %v1077_v59 = vpop.f32.mrf.mxu1 }
 0x33f   :  { %v1325_v61 = vpop.f32.mrf.mxu0  ;;  %v1078_v14 = vadd.f32 %v1077_v59, %v1000_v5  ;;  %v1577_v19 = vmul.f32 %v1084_v10, %v1862_v0 }
 0x340   :  { %v1755_v62 = vpop.f32.mrf.mxu1 }
 0x341   :  { %v1252_v2 = vadd.f32 %v1755_v62, %v1750_v52  ;;  %v1770_v8 = vpop.f32.mrf.mxu0  ;;  %v1576_v23 = vmul.f32 %v1078_v14, %v1867_v1 }
 0x342   :  { %v1245_v4 = vpop.f32.mrf.mxu1 }
 0x343   :  { %v1246_v6 = vadd.f32 %v1245_v4, %v1159_v55  ;;  %v1333_v7 = vadd.f32 %v1760_v58, %v1252_v2  ;;  %v1488_v17 = vpop.f32.mrf.mxu0 }
 0x344   :  { %v1765_v9 = vpop.f32.mrf.mxu1 }
 0x345   :  { %v1415_v11 = vadd.f32 %v1765_v9, %v1333_v7  ;;  %v1326_v12 = vadd.f32 %v1325_v61, %v1246_v6 }
 0x346   :  { %v1406_v13 = vpop.f32.mrf.mxu1 }
 0x347   :  { %v1407_v15 = vadd.f32 %v1406_v13, %v1326_v12  ;;  %v1495_v16 = vadd.f32 %v1770_v8, %v1415_v11 }
 0x348   :  { %v1775_v18 = vpop.f32.mrf.mxu1 }
 0x349   :  { %v1573_v20 = vadd.f32 %v1775_v18, %v1495_v16  ;;  %v1489_v21 = vadd.f32 %v1488_v17, %v1407_v15 }
 0x34a   :  { %v1566_v22 = vpop.f32.mrf.mxu1 }
 0x34b   :  { %v1579_v24 = vadd.f32 %v1577_v19, %v1573_v20  ;;  %v1567_v25 = vadd.f32 %v1566_v22, %v1489_v21 }
 0x34d   :  { %1581 = vst.msk [vmem:[#allocation2 + $0x8] sm:$0xff] %vm46_vm3, %v1579_v24  ;;  %v1578_v26 = vadd.f32 %v1576_v23, %v1567_v25 }
 0x34f   :  { %1580 = vst.msk [vmem:[#allocation2] sm:$0xff] %vm46_vm3, %v1578_v26 }
 0x350   :  { %1805 = shalt.err (!%p1802_p4)
}
 0x351   :  { %s1822_s12 = smov 128   ;;  %s1823_s13 = smov 8  }
 0x352   :  { %1593 = dma.vmem_to_hbm [thread:$0]  %s1588_s5, 256, %s1987_s6, [#allocation3], %s1822_s12, %s1822_s12, %s1823_s13  }
 0x353   :  { %1814 = dma.done.wait [#allocation3], 256  }
 0x354   :  { %1815 = vsyncadd [#allocation3], 4294967040 }
 0x355   :  { %1597 = vsyncpa [#allocation3], 1 }

</bundles_post_ra>
